<compile_context>
chip_gen: v7x
topology: tpu7x:2x2x1
jax: 0.10.0
libtpu: 0.0.40
codegen_flags: <defaults>
</compile_context>

<pallas_src>
import jax
import jax.numpy as jnp
from jax.experimental import pallas as pl
from jax.experimental.pallas import tpu as pltpu


def make_agent_kernel(T, L, H, A, LD, HEAD_PAD):
    """Fused multi-layer GRU + actor/critic heads kernel.

    T timesteps, L GRU layers, hidden dim H, action dim A, critic hidden LD,
    HEAD_PAD = lane-padded width of the fused head weight / output slab.
    """

    def kernel(*refs):
        idx = 0
        x_ref = refs[idx]; idx += 1               # (T, B, D)
        h0_ref = refs[idx]; idx += 1              # (L, B, H)
        w_i_refs = list(refs[idx:idx + L]); idx += L   # each (K_in_l, 3H)
        w_h_ref = refs[idx]; idx += 1             # (L, H, 3H)
        b_x_ref = refs[idx]; idx += 1             # (L, 1, 3H)  [bir+bhr|biz+bhz|bin]
        b_hn_ref = refs[idx]; idx += 1            # (L, 1, H)
        w_head_ref = refs[idx]; idx += 1          # (H, HEAD_PAD) [w_mean | w_c1 | 0]
        b_head_ref = refs[idx]; idx += 1          # (1, HEAD_PAD)
        w_c2_ref = refs[idx]; idx += 1            # (1, LD)
        b_c2_ref = refs[idx]; idx += 1            # (1, 1)
        logstd_ref = refs[idx]; idx += 1          # (1, A)
        x_out_ref, heads_ref, std_ref, hN_ref = refs[idx:idx + 4]

        # std = exp(actor_logstd)  (written once)
        std_ref[...] = jnp.exp(logstd_ref[...])

        B = x_ref.shape[1]

        # ---- loop-invariant hoists: load every parameter from VMEM once ----
        lane = jax.lax.broadcasted_iota(jnp.int32, (B, HEAD_PAD), 1)
        w_head = w_head_ref[...]                  # (H, HEAD_PAD)
        b_head = b_head_ref[...]                  # (1, HEAD_PAD)
        w_c2_row = w_c2_ref[...]                  # (1, LD)
        b_c2 = b_c2_ref[...]                      # (1, 1)
        w_i = [w_i_refs[l][...] for l in range(L)]   # (K_l, 3H) each
        w_h = [w_h_ref[l] for l in range(L)]         # (H, 3H) each
        b_x = [b_x_ref[l] for l in range(L)]         # (1, 3H) each
        b_hn = [b_hn_ref[l] for l in range(L)]       # (1, H) each

        # Hidden state lives in vregs across the (small, static) t/l unroll.
        h = [h0_ref[l] for l in range(L)]

        for t in range(T):                        # T is small & static -> unrolled
            layer_in = x_ref[t]                   # (B, D)
            for l in range(L):                    # static unroll over GRU layers
                h_prev = h[l]                     # (B, H)
                # fused input-gate dot: (B, K) @ (K, 3H)
                gx = jnp.dot(layer_in, w_i[l],
                             preferred_element_type=jnp.float32) + b_x[l]
                # fused hidden-gate dot: (B, H) @ (H, 3H)
                gh = jnp.dot(h_prev, w_h[l],
                             preferred_element_type=jnp.float32)
                rz = jax.nn.sigmoid(gx[:, :2 * H] + gh[:, :2 * H])
                r = rz[:, :H]
                z = rz[:, H:]
                n = jnp.tanh(gx[:, 2 * H:] + r * (gh[:, 2 * H:] + b_hn[l]))
                h_new = (1.0 - z) * n + z * h_prev
                h[l] = h_new
                layer_in = h_new

            # top-layer GRU output for this timestep
            x_out_ref[t] = layer_in

            # Fused heads: single dot gives [mu-preact | critic-hidden | 0...]
            pre = jnp.dot(layer_in, w_head,
                          preferred_element_type=jnp.float32) + b_head
            mu_full = jnp.tanh(pre)               # only lanes [0:A] meaningful
            v1 = pre[:, A:A + LD]                 # critic layer-1 (no activation)
            # critic layer-2 (N=1): VPU multiply + lane reduction instead of MXU dot
            v = jnp.sum(v1 * w_c2_row, axis=-1, keepdims=True) + b_c2   # (B, 1)
            # lane-dense output slab: lanes [0:A] = mu, lane A = value, rest 0
            heads_ref[t] = jnp.where(lane < A, mu_full,
                                     jnp.where(lane == A, v, 0.0))

        # new hidden written once, after the time loop
        for l in range(L):
            hN_ref[l] = h[l]

    return kernel


def agent_forward(transition, hidden, params):
    """Pallas-backed Agent forward: returns (x, mu, std, value, new_hidden)."""
    T, B, D = transition.shape
    L, _, H = hidden.shape
    A = params["w_mean"].shape[1]
    LD = params["w_c1"].shape[1]
    HEAD_PAD = ((A + LD + 127) // 128) * 128

    # Pad batch to a multiple of 8 sublanes (free on HW, sliced off below).
    B_pad = max(8, ((B + 7) // 8) * 8)
    if B_pad != B:
        pad = B_pad - B
        transition_p = jnp.pad(transition, ((0, 0), (0, pad), (0, 0)))
        hidden_p = jnp.pad(hidden, ((0, 0), (0, pad), (0, 0)))
    else:
        transition_p, hidden_p = transition, hidden

    # ---- wrapper-side parameter packing (few contiguous buffers) ----
    w_i_list, w_h_list, b_x_list, b_hn_list = [], [], [], []
    for l in range(L):
        p = params["gru"][l]
        w_i_list.append(jnp.concatenate([p["w_ir"], p["w_iz"], p["w_in"]], axis=1))
        w_h_list.append(jnp.concatenate([p["w_hr"], p["w_hz"], p["w_hn"]], axis=1))
        b_x_list.append(jnp.concatenate([p["b_ir"] + p["b_hr"],
                                         p["b_iz"] + p["b_hz"],
                                         p["b_in"]], axis=1))
        b_hn_list.append(p["b_hn"])
    w_h_all = jnp.stack(w_h_list)      # (L, H, 3H)
    b_x_all = jnp.stack(b_x_list)      # (L, 1, 3H)
    b_hn_all = jnp.stack(b_hn_list)    # (L, 1, H)

    # Fused head weight: [w_mean | w_c1 | zeros] padded to HEAD_PAD lanes.
    w_head = jnp.zeros((H, HEAD_PAD), jnp.float32)
    w_head = w_head.at[:, :A].set(params["w_mean"]).at[:, A:A + LD].set(params["w_c1"])
    b_head = jnp.zeros((1, HEAD_PAD), jnp.float32)
    b_head = b_head.at[:, :A].set(params["b_mean"]).at[:, A:A + LD].set(params["b_c1"])
    w_c2_row = params["w_c2"].T        # (1, LD)
    b_c2 = params["b_c2"]              # (1, 1)
    logstd = params["logstd"]          # (1, A)

    inputs = ([transition_p, hidden_p] + w_i_list +
              [w_h_all, b_x_all, b_hn_all, w_head, b_head, w_c2_row, b_c2, logstd])

    out_shape = (
        jax.ShapeDtypeStruct((T, B_pad, H), jnp.float32),         # x (GRU output)
        jax.ShapeDtypeStruct((T, B_pad, HEAD_PAD), jnp.float32),  # [mu | value | 0] slab
        jax.ShapeDtypeStruct((1, A), jnp.float32),                # std = exp(logstd)
        jax.ShapeDtypeStruct((L, B_pad, H), jnp.float32),         # new_hidden
    )

    vmem = pl.BlockSpec(memory_space=pltpu.MemorySpace.VMEM)
    kernel = make_agent_kernel(T, L, H, A, LD, HEAD_PAD)
    x_full, heads, std, hN_full = pl.pallas_call(
        kernel,
        out_shape=out_shape,
        in_specs=[vmem] * len(inputs),
        out_specs=tuple([vmem] * len(out_shape)),
    )(*inputs)

    x = x_full[:, :B]
    mu = heads[:, :B, :A]
    value = heads[:, :B, A:A + 1]
    new_hidden = hN_full[:, :B]
    return x, mu, std, value, new_hidden


def agent_forward_ref(transition, hidden, params):
    """Pure-JAX reference with identical semantics (for correctness check)."""
    T = transition.shape[0]
    L = hidden.shape[0]
    new_h = [hidden[l] for l in range(L)]
    xs = []
    for t in range(T):
        layer_in = transition[t]
        for l in range(L):
            p = params["gru"][l]
            h_prev = new_h[l]
            r = jax.nn.sigmoid(layer_in @ p["w_ir"] + p["b_ir"]
                               + h_prev @ p["w_hr"] + p["b_hr"])
            z = jax.nn.sigmoid(layer_in @ p["w_iz"] + p["b_iz"]
                               + h_prev @ p["w_hz"] + p["b_hz"])
            n = jnp.tanh(layer_in @ p["w_in"] + p["b_in"]
                         + r * (h_prev @ p["w_hn"] + p["b_hn"]))
            h_new = (1.0 - z) * n + z * h_prev
            new_h[l] = h_new
            layer_in = h_new
        xs.append(layer_in)
    x = jnp.stack(xs)
    mu = jnp.tanh(x @ params["w_mean"] + params["b_mean"])
    std = jnp.exp(params["logstd"])
    v = (x @ params["w_c1"] + params["b_c1"]) @ params["w_c2"] + params["b_c2"]
    return x, mu, std, v, jnp.stack(new_h)


def init_params(key, D, H, A, LD, L):
    """Deterministic synthetic parameters (shapes match the nn.Module __init__)."""
    keys = iter(jax.random.split(key, 12 * L + 8))

    def mat(shape, scale=0.2):
        return jax.random.normal(next(keys), shape, jnp.float32) * scale

    gru = []
    for l in range(L):
        in_dim = D if l == 0 else H
        gru.append({
            "w_ir": mat((in_dim, H)), "w_iz": mat((in_dim, H)), "w_in": mat((in_dim, H)),
            "w_hr": mat((H, H)),      "w_hz": mat((H, H)),      "w_hn": mat((H, H)),
            "b_ir": mat((1, H), 0.05), "b_iz": mat((1, H), 0.05), "b_in": mat((1, H), 0.05),
            "b_hr": mat((1, H), 0.05), "b_hz": mat((1, H), 0.05), "b_hn": mat((1, H), 0.05),
        })
    return {
        "gru": gru,
        "w_mean": mat((H, A)), "b_mean": jnp.zeros((1, A), jnp.float32),
        "logstd": jnp.zeros((1, A), jnp.float32),          # nn.Parameter(zeros(1, A))
        "w_c1": mat((H, LD)),  "b_c1": jnp.zeros((1, LD), jnp.float32),
        "w_c2": mat((LD, 1)),  "b_c2": jnp.zeros((1, 1), jnp.float32),
    }


if __name__ == "__main__":
    # configs consistent with the module: trans_dim = state_dim + action_dim + 2
    state_dim, action_dim = 8, 2
    D = state_dim + action_dim + 2      # trans_dim = 12
    H = 32                              # hidden_dim
    LD = 32                             # linear_dim
    A = action_dim
    L = 2                               # num_rnn_layers
    T, B = 1, 4                         # seq_len=1 (as _format produces), minibatch=4

    key = jax.random.PRNGKey(0)
    k_t, k_h, k_p = jax.random.split(key, 3)
    transition = jax.random.normal(k_t, (T, B, D), jnp.float32)
    hidden = jax.random.normal(k_h, (L, B, H), jnp.float32)
    params = init_params(k_p, D, H, A, LD, L)

    outs = jax.block_until_ready(agent_forward(transition, hidden, params))
    refs = agent_forward_ref(transition, hidden, params)

    names = ["x", "mu", "std", "value", "new_hidden"]
    for name, o, r in zip(names, outs, refs):
        assert o.shape == r.shape, (name, o.shape, r.shape)
        assert jnp.allclose(o, r, rtol=1e-4, atol=1e-4), name

    print("KERNEL_OK")
</pallas_src>

<mosaic_0001>
module attributes {stable_mosaic.version = 11 : i64} {
  func.func @kernel(%arg0: memref<1x8x12xf32, #tpu.memory_space<vmem>>, %arg1: memref<2x8x32xf32, #tpu.memory_space<vmem>>, %arg2: memref<12x96xf32, #tpu.memory_space<vmem>>, %arg3: memref<32x96xf32, #tpu.memory_space<vmem>>, %arg4: memref<2x32x96xf32, #tpu.memory_space<vmem>>, %arg5: memref<2x1x96xf32, #tpu.memory_space<vmem>>, %arg6: memref<2x1x32xf32, #tpu.memory_space<vmem>>, %arg7: memref<32x128xf32, #tpu.memory_space<vmem>>, %arg8: memref<1x128xf32, #tpu.memory_space<vmem>>, %arg9: memref<1x32xf32, #tpu.memory_space<vmem>>, %arg10: memref<1x1xf32, #tpu.memory_space<vmem>>, %arg11: memref<1x2xf32, #tpu.memory_space<vmem>>, %arg12: memref<1x8x32xf32, #tpu.memory_space<vmem>>, %arg13: memref<1x8x128xf32, #tpu.memory_space<vmem>>, %arg14: memref<1x2xf32, #tpu.memory_space<vmem>>, %arg15: memref<2x8x32xf32, #tpu.memory_space<vmem>>) attributes {dimension_semantics = [], scalar_prefetch = 0 : i64, scratch_operands = 0 : i64, tpu.core_type = #tpu.core_type<tc>} {
    %c0 = arith.constant 0 : index
    %c0_0 = arith.constant 0 : index
    %0 = vector.load %arg11[%c0, %c0_0] : memref<1x2xf32, #tpu.memory_space<vmem>>, vector<1x2xf32>
    %1 = math.exp %0 : vector<1x2xf32>
    %c0_1 = arith.constant 0 : index
    %c0_2 = arith.constant 0 : index
    %2 = vector.load %arg14[%c0_1, %c0_2] : memref<1x2xf32, #tpu.memory_space<vmem>>, vector<1x2xf32>
    tpu.vector_store %arg14[%c0_1, %c0_2], %1 {strides = array<i32>} : memref<1x2xf32, #tpu.memory_space<vmem>>, vector<1x2xf32>,
    %3 = tpu.iota {dimensions = array<i32: 1>} : vector<8x128xi32>
    %c0_3 = arith.constant 0 : index
    %c0_4 = arith.constant 0 : index
    %4 = vector.load %arg7[%c0_3, %c0_4] : memref<32x128xf32, #tpu.memory_space<vmem>>, vector<32x128xf32>
    %c0_5 = arith.constant 0 : index
    %c0_6 = arith.constant 0 : index
    %5 = vector.load %arg8[%c0_5, %c0_6] : memref<1x128xf32, #tpu.memory_space<vmem>>, vector<1x128xf32>
    %c0_7 = arith.constant 0 : index
    %c0_8 = arith.constant 0 : index
    %6 = vector.load %arg9[%c0_7, %c0_8] : memref<1x32xf32, #tpu.memory_space<vmem>>, vector<1x32xf32>
    %c0_9 = arith.constant 0 : index
    %c0_10 = arith.constant 0 : index
    %7 = vector.load %arg10[%c0_9, %c0_10] : memref<1x1xf32, #tpu.memory_space<vmem>>, vector<1x1xf32>
    %c0_11 = arith.constant 0 : index
    %c0_12 = arith.constant 0 : index
    %8 = vector.load %arg2[%c0_11, %c0_12] : memref<12x96xf32, #tpu.memory_space<vmem>>, vector<12x96xf32>
    %c0_13 = arith.constant 0 : index
    %c0_14 = arith.constant 0 : index
    %9 = vector.load %arg3[%c0_13, %c0_14] : memref<32x96xf32, #tpu.memory_space<vmem>>, vector<32x96xf32>
    %c0_15 = arith.constant 0 : index
    %c0_16 = arith.constant 0 : index
    %c0_17 = arith.constant 0 : index
    %10 = vector.load %arg4[%c0_15, %c0_16, %c0_17] : memref<2x32x96xf32, #tpu.memory_space<vmem>>, vector<1x32x96xf32>
    %11 = vector.shape_cast %10 : vector<1x32x96xf32> to vector<32x96xf32>
    %c1 = arith.constant 1 : index
    %c0_18 = arith.constant 0 : index
    %c0_19 = arith.constant 0 : index
    %12 = vector.load %arg4[%c1, %c0_18, %c0_19] : memref<2x32x96xf32, #tpu.memory_space<vmem>>, vector<1x32x96xf32>
    %13 = vector.shape_cast %12 : vector<1x32x96xf32> to vector<32x96xf32>
    %c0_20 = arith.constant 0 : index
    %c0_21 = arith.constant 0 : index
    %c0_22 = arith.constant 0 : index
    %14 = vector.load %arg5[%c0_20, %c0_21, %c0_22] : memref<2x1x96xf32, #tpu.memory_space<vmem>>, vector<1x1x96xf32>
    %15 = vector.shape_cast %14 : vector<1x1x96xf32> to vector<1x96xf32>
    %c1_23 = arith.constant 1 : index
    %c0_24 = arith.constant 0 : index
    %c0_25 = arith.constant 0 : index
    %16 = vector.load %arg5[%c1_23, %c0_24, %c0_25] : memref<2x1x96xf32, #tpu.memory_space<vmem>>, vector<1x1x96xf32>
    %17 = vector.shape_cast %16 : vector<1x1x96xf32> to vector<1x96xf32>
    %c0_26 = arith.constant 0 : index
    %c0_27 = arith.constant 0 : index
    %c0_28 = arith.constant 0 : index
    %18 = vector.load %arg6[%c0_26, %c0_27, %c0_28] : memref<2x1x32xf32, #tpu.memory_space<vmem>>, vector<1x1x32xf32>
    %19 = vector.shape_cast %18 : vector<1x1x32xf32> to vector<1x32xf32>
    %c1_29 = arith.constant 1 : index
    %c0_30 = arith.constant 0 : index
    %c0_31 = arith.constant 0 : index
    %20 = vector.load %arg6[%c1_29, %c0_30, %c0_31] : memref<2x1x32xf32, #tpu.memory_space<vmem>>, vector<1x1x32xf32>
    %21 = vector.shape_cast %20 : vector<1x1x32xf32> to vector<1x32xf32>
    %c0_32 = arith.constant 0 : index
    %c0_33 = arith.constant 0 : index
    %c0_34 = arith.constant 0 : index
    %22 = vector.load %arg1[%c0_32, %c0_33, %c0_34] : memref<2x8x32xf32, #tpu.memory_space<vmem>>, vector<1x8x32xf32>
    %23 = vector.shape_cast %22 : vector<1x8x32xf32> to vector<8x32xf32>
    %c1_35 = arith.constant 1 : index
    %c0_36 = arith.constant 0 : index
    %c0_37 = arith.constant 0 : index
    %24 = vector.load %arg1[%c1_35, %c0_36, %c0_37] : memref<2x8x32xf32, #tpu.memory_space<vmem>>, vector<1x8x32xf32>
    %25 = vector.shape_cast %24 : vector<1x8x32xf32> to vector<8x32xf32>
    %c0_38 = arith.constant 0 : index
    %c0_39 = arith.constant 0 : index
    %c0_40 = arith.constant 0 : index
    %26 = vector.load %arg0[%c0_38, %c0_39, %c0_40] : memref<1x8x12xf32, #tpu.memory_space<vmem>>, vector<1x8x12xf32>
    %27 = vector.shape_cast %26 : vector<1x8x12xf32> to vector<8x12xf32>
    %cst = arith.constant dense<0.000000e+00> : vector<8x96xf32>
    %28 = tpu.matmul %27, %8, %cst {dimension_numbers = #tpu.dot_dimension_numbers<[1], [0], [0], [1], [0, 0, 1, 1], [], []>} : vector<8x12xf32>, vector<12x96xf32>, vector<8x96xf32> -> vector<8x96xf32>
    %29 = vector.broadcast %15 : vector<1x96xf32> to vector<8x96xf32>
    %30 = arith.addf %28, %29 : vector<8x96xf32>
    %cst_41 = arith.constant dense<0.000000e+00> : vector<8x96xf32>
    %31 = tpu.matmul %23, %11, %cst_41 {dimension_numbers = #tpu.dot_dimension_numbers<[1], [0], [0], [1], [0, 0, 1, 1], [], []>} : vector<8x32xf32>, vector<32x96xf32>, vector<8x96xf32> -> vector<8x96xf32>
    %32 = vector.extract_strided_slice %30 {offsets = [0, 0], sizes = [8, 64], strides = [1, 1]} : vector<8x96xf32> to vector<8x64xf32>
    %33 = vector.extract_strided_slice %31 {offsets = [0, 0], sizes = [8, 64], strides = [1, 1]} : vector<8x96xf32> to vector<8x64xf32>
    %34 = arith.addf %32, %33 : vector<8x64xf32>
    %35 = arith.negf %34 : vector<8x64xf32>
    %36 = math.exp %35 : vector<8x64xf32>
    %cst_42 = arith.constant 1.000000e+00 : f32
    %37 = vector.broadcast %cst_42 : f32 to vector<8x64xf32>
    %38 = arith.addf %37, %36 : vector<8x64xf32>
    %39 = arith.divf %37, %38 : vector<8x64xf32>
    %40 = vector.extract_strided_slice %39 {offsets = [0, 0], sizes = [8, 32], strides = [1, 1]} : vector<8x64xf32> to vector<8x32xf32>
    %41 = vector.extract_strided_slice %39 {offsets = [0, 32], sizes = [8, 32], strides = [1, 1]} : vector<8x64xf32> to vector<8x32xf32>
    %42 = vector.extract_strided_slice %30 {offsets = [0, 64], sizes = [8, 32], strides = [1, 1]} : vector<8x96xf32> to vector<8x32xf32>
    %43 = vector.extract_strided_slice %31 {offsets = [0, 64], sizes = [8, 32], strides = [1, 1]} : vector<8x96xf32> to vector<8x32xf32>
    %44 = vector.broadcast %19 : vector<1x32xf32> to vector<8x32xf32>
    %45 = arith.addf %43, %44 : vector<8x32xf32>
    %46 = arith.mulf %40, %45 : vector<8x32xf32>
    %47 = arith.addf %42, %46 : vector<8x32xf32>
    %48 = math.tanh %47 : vector<8x32xf32>
    %cst_43 = arith.constant 1.000000e+00 : f32
    %49 = vector.broadcast %cst_43 : f32 to vector<8x32xf32>
    %50 = arith.subf %49, %41 : vector<8x32xf32>
    %51 = arith.mulf %50, %48 : vector<8x32xf32>
    %52 = arith.mulf %41, %23 : vector<8x32xf32>
    %53 = arith.addf %51, %52 : vector<8x32xf32>
    %cst_44 = arith.constant dense<0.000000e+00> : vector<8x96xf32>
    %54 = tpu.matmul %53, %9, %cst_44 {dimension_numbers = #tpu.dot_dimension_numbers<[1], [0], [0], [1], [0, 0, 1, 1], [], []>} : vector<8x32xf32>, vector<32x96xf32>, vector<8x96xf32> -> vector<8x96xf32>
    %55 = vector.broadcast %17 : vector<1x96xf32> to vector<8x96xf32>
    %56 = arith.addf %54, %55 : vector<8x96xf32>
    %cst_45 = arith.constant dense<0.000000e+00> : vector<8x96xf32>
    %57 = tpu.matmul %25, %13, %cst_45 {dimension_numbers = #tpu.dot_dimension_numbers<[1], [0], [0], [1], [0, 0, 1, 1], [], []>} : vector<8x32xf32>, vector<32x96xf32>, vector<8x96xf32> -> vector<8x96xf32>
    %58 = vector.extract_strided_slice %56 {offsets = [0, 0], sizes = [8, 64], strides = [1, 1]} : vector<8x96xf32> to vector<8x64xf32>
    %59 = vector.extract_strided_slice %57 {offsets = [0, 0], sizes = [8, 64], strides = [1, 1]} : vector<8x96xf32> to vector<8x64xf32>
    %60 = arith.addf %58, %59 : vector<8x64xf32>
    %61 = arith.negf %60 : vector<8x64xf32>
    %62 = math.exp %61 : vector<8x64xf32>
    %cst_46 = arith.constant 1.000000e+00 : f32
    %63 = vector.broadcast %cst_46 : f32 to vector<8x64xf32>
    %64 = arith.addf %63, %62 : vector<8x64xf32>
    %65 = arith.divf %63, %64 : vector<8x64xf32>
    %66 = vector.extract_strided_slice %65 {offsets = [0, 0], sizes = [8, 32], strides = [1, 1]} : vector<8x64xf32> to vector<8x32xf32>
    %67 = vector.extract_strided_slice %65 {offsets = [0, 32], sizes = [8, 32], strides = [1, 1]} : vector<8x64xf32> to vector<8x32xf32>
    %68 = vector.extract_strided_slice %56 {offsets = [0, 64], sizes = [8, 32], strides = [1, 1]} : vector<8x96xf32> to vector<8x32xf32>
    %69 = vector.extract_strided_slice %57 {offsets = [0, 64], sizes = [8, 32], strides = [1, 1]} : vector<8x96xf32> to vector<8x32xf32>
    %70 = vector.broadcast %21 : vector<1x32xf32> to vector<8x32xf32>
    %71 = arith.addf %69, %70 : vector<8x32xf32>
    %72 = arith.mulf %66, %71 : vector<8x32xf32>
    %73 = arith.addf %68, %72 : vector<8x32xf32>
    %74 = math.tanh %73 : vector<8x32xf32>
    %cst_47 = arith.constant 1.000000e+00 : f32
    %75 = vector.broadcast %cst_47 : f32 to vector<8x32xf32>
    %76 = arith.subf %75, %67 : vector<8x32xf32>
    %77 = arith.mulf %76, %74 : vector<8x32xf32>
    %78 = arith.mulf %67, %25 : vector<8x32xf32>
    %79 = arith.addf %77, %78 : vector<8x32xf32>
    %c0_48 = arith.constant 0 : index
    %c0_49 = arith.constant 0 : index
    %c0_50 = arith.constant 0 : index
    %80 = vector.load %arg12[%c0_48, %c0_49, %c0_50] : memref<1x8x32xf32, #tpu.memory_space<vmem>>, vector<1x8x32xf32>
    %81 = vector.shape_cast %80 : vector<1x8x32xf32> to vector<8x32xf32>
    %82 = vector.shape_cast %79 : vector<8x32xf32> to vector<1x8x32xf32>
    tpu.vector_store %arg12[%c0_48, %c0_49, %c0_50], %82 {strides = array<i32>} : memref<1x8x32xf32, #tpu.memory_space<vmem>>, vector<1x8x32xf32>,
    %cst_51 = arith.constant dense<0.000000e+00> : vector<8x128xf32>
    %83 = tpu.matmul %79, %4, %cst_51 {dimension_numbers = #tpu.dot_dimension_numbers<[1], [0], [0], [1], [0, 0, 1, 1], [], []>} : vector<8x32xf32>, vector<32x128xf32>, vector<8x128xf32> -> vector<8x128xf32>
    %84 = vector.broadcast %5 : vector<1x128xf32> to vector<8x128xf32>
    %85 = arith.addf %83, %84 : vector<8x128xf32>
    %86 = math.tanh %85 : vector<8x128xf32>
    %87 = vector.extract_strided_slice %85 {offsets = [0, 2], sizes = [8, 32], strides = [1, 1]} : vector<8x128xf32> to vector<8x32xf32>
    %88 = vector.broadcast %6 : vector<1x32xf32> to vector<8x32xf32>
    %89 = arith.mulf %87, %88 : vector<8x32xf32>
    %cst_52 = arith.constant dense<0.000000e+00> : vector<8xf32>
    %90 = vector.multi_reduction <add>, %89, %cst_52 [1] : vector<8x32xf32> to vector<8xf32>
    %91 = vector.shape_cast %90 : vector<8xf32> to vector<8x1xf32>
    %92 = vector.broadcast %7 : vector<1x1xf32> to vector<8x1xf32>
    %93 = arith.addf %91, %92 : vector<8x1xf32>
    %c2_i32 = arith.constant 2 : i32
    %94 = vector.broadcast %c2_i32 : i32 to vector<8x128xi32>
    %95 = arith.cmpi slt, %3, %94 : vector<8x128xi32>
    %c2_i32_53 = arith.constant 2 : i32
    %96 = vector.broadcast %c2_i32_53 : i32 to vector<8x128xi32>
    %97 = arith.cmpi eq, %3, %96 : vector<8x128xi32>
    %cst_54 = arith.constant 0.000000e+00 : f32
    %98 = vector.shape_cast %93 : vector<8x1xf32> to vector<8x1xf32>
    %99 = vector.broadcast %98 : vector<8x1xf32> to vector<8x128xf32>
    %100 = vector.broadcast %cst_54 : f32 to vector<8x128xf32>
    %101 = arith.select %97, %99, %100 : vector<8x128xi1>, vector<8x128xf32>
    %102 = arith.select %95, %86, %101 : vector<8x128xi1>, vector<8x128xf32>
    %c0_55 = arith.constant 0 : index
    %c0_56 = arith.constant 0 : index
    %c0_57 = arith.constant 0 : index
    %103 = vector.load %arg13[%c0_55, %c0_56, %c0_57] : memref<1x8x128xf32, #tpu.memory_space<vmem>>, vector<1x8x128xf32>
    %104 = vector.shape_cast %103 : vector<1x8x128xf32> to vector<8x128xf32>
    %105 = vector.shape_cast %102 : vector<8x128xf32> to vector<1x8x128xf32>
    tpu.vector_store %arg13[%c0_55, %c0_56, %c0_57], %105 {strides = array<i32>} : memref<1x8x128xf32, #tpu.memory_space<vmem>>, vector<1x8x128xf32>,
    %c0_58 = arith.constant 0 : index
    %c0_59 = arith.constant 0 : index
    %c0_60 = arith.constant 0 : index
    %106 = vector.load %arg15[%c0_58, %c0_59, %c0_60] : memref<2x8x32xf32, #tpu.memory_space<vmem>>, vector<1x8x32xf32>
    %107 = vector.shape_cast %106 : vector<1x8x32xf32> to vector<8x32xf32>
    %108 = vector.shape_cast %53 : vector<8x32xf32> to vector<1x8x32xf32>
    tpu.vector_store %arg15[%c0_58, %c0_59, %c0_60], %108 {strides = array<i32>} : memref<2x8x32xf32, #tpu.memory_space<vmem>>, vector<1x8x32xf32>,
    %c1_61 = arith.constant 1 : index
    %c0_62 = arith.constant 0 : index
    %c0_63 = arith.constant 0 : index
    %109 = vector.load %arg15[%c1_61, %c0_62, %c0_63] : memref<2x8x32xf32, #tpu.memory_space<vmem>>, vector<1x8x32xf32>
    %110 = vector.shape_cast %109 : vector<1x8x32xf32> to vector<8x32xf32>
    %111 = vector.shape_cast %79 : vector<8x32xf32> to vector<1x8x32xf32>
    tpu.vector_store %arg15[%c1_61, %c0_62, %c0_63], %111 {strides = array<i32>} : memref<2x8x32xf32, #tpu.memory_space<vmem>>, vector<1x8x32xf32>,
    return
  }
}

</mosaic_0001>

<bundles_post_ra>
// kernel: tpu_custom_call.1
= control target key start
LH: loop header
LB: loop body
LE: loop exit
PB: predicated region body
PF: predicated region fallthrough
CT: control target
= control target key end

     0   :  { %s1435_s0 = inlined_call_operand.hbm [shape: f32[1,8,12], index: 0, kind: input, shape index: {}]   ;;  %s1436_s1 = inlined_call_operand.hbm [shape: f32[2,8,32], index: 1, kind: input, shape index: {}]   ;;  %s1437_s2 = inlined_call_operand.hbm [shape: f32[12,96], index: 2, kind: input, shape index: {}]   ;;  %s1438_s3 = inlined_call_operand.hbm [shape: f32[32,96], index: 3, kind: input, shape index: {}]   ;;  %s1439_s4 = inlined_call_operand.hbm [shape: f32[2,32,96], index: 4, kind: input, shape index: {}]   ;;  %s1440_s5 = inlined_call_operand.vmem [shape: f32[2,1,96], index: 5, kind: input, shape index: {}]   ;;  %s1441_s6 = inlined_call_operand.vmem [shape: f32[2,1,32], index: 6, kind: input, shape index: {}]   ;;  %s1442_s7 = inlined_call_operand.hbm [shape: f32[32,128], index: 7, kind: input, shape index: {}]   ;;  %s1443_s8 = inlined_call_operand.vmem [shape: f32[1,128], index: 8, kind: input, shape index: {}]   ;;  %s1444_s9 = inlined_call_operand.vmem [shape: f32[1,32], index: 9, kind: input, shape index: {}]   ;;  %s1445_s10 = inlined_call_operand.<no memory space> [shape: f32[1,1], index: 10, kind: input, shape index: {}]   ;;  %s1446_s11 = inlined_call_operand.vmem [shape: f32[1,2], index: 11, kind: input, shape index: {}]   ;;  %s1447_s12 = inlined_call_operand.hbm [shape: f32[1,8,32], index: 12, kind: output, shape index: {0}]   ;;  %s1448_s13 = inlined_call_operand.hbm [shape: f32[1,8,128], index: 13, kind: output, shape index: {1}]   ;;  %s1449_s14 = inlined_call_operand.hbm [shape: f32[1,2], index: 14, kind: output, shape index: {2}]   ;;  %s1450_s15 = inlined_call_operand.hbm [shape: f32[2,8,32], index: 15, kind: output, shape index: {3}]  }
   0x1   :  { %v21_v0 = vstv %s1445_s10 }
   0x2   :  { %22 = vst [vmem:[#allocation2] sm:$0x1] %v21_v0 }
   0x3   :  { %23 = vsyncpa [#allocation4], 0 }
   0x4   :  { %24 = vsyncpa [#allocation7], 0 }
   0x5   :  { %25 = vsyncpa [#allocation10], 0 }
   0x6   :  { %26 = vsyncpa [#allocation13], 0 }
   0x7   :  { %27 = vsyncpa [#allocation5], 0 }
   0x8   :  { %28 = vsyncpa [#allocation16], 0 }
   0x9   :  { %29 = vsyncpa [#allocation19], 0  ;;  %s1132_s20 = smov [#allocation6]   ;;  %s898_s24 = scalar_lea.hbm %s1436_s1, 256 }
   0xa   :  { %s45_s21 = sshll.u32 %s1132_s20, 4  ;;  %p899_p0 = scmp.ne.s32.totalorder %s1436_s1, %s898_s24  ;;  %s46_s21 = int_to_ptr.vmem [resolvable:$true] %s45_s21 }
   0xb   :  { %p902_p1 = scmp.lt.u32.totalorder %s898_s24, %s1436_s1 }
   0xd   :  { %p904_p2 = pnand %p902_p1, %p899_p0 }
   0xf   :  { %907 = shalt.err (!%p904_p2)
}
  0x10   :  { %s908_s28 = scalar_lea.vmem %s46_s21, 256  ;;  %p913_p4 = scmp.lt.s32.totalorder %s46_s21, %s46_s21 }
  0x11   :  { %p909_p3 = scmp.ne.s32.totalorder %s46_s21, %s908_s28  ;;  %p914_p5 = scmp.lt.s32.totalorder %s908_s28, %s908_s28 }
  0x13   :  { %p915_p6 = por %p914_p5, %p913_p4 }
  0x15   :  { %p916_p7 = pnand %p915_p6, %p909_p3 }
  0x17   :  { %919 = shalt.err (!%p916_p7)
}
  0x18   :  { %s1133_s29 = smov 128   ;;  %s1134_s30 = smov 8  }
  0x19   :  { %51 = dma.hbm_to_vmem [thread:$0]  %s1436_s1, 256, %s46_s21, [#allocation7], %s1133_s29, %s1133_s29, %s1134_s30  }
  0x1a   :  { %s1135_s18 = smov [#allocation9]   ;;  %s1136_s20 = smov [#allocation3]  }
  0x1b   :  { %s69_s19 = sshll.u32 %s1135_s18, 4  ;;  %s36_s22 = sshll.u32 %s1136_s20, 4  ;;  %s70_s19 = int_to_ptr.vmem [resolvable:$true] %s69_s19  ;;  %s37_s22 = int_to_ptr.vmem [resolvable:$true] %s36_s22 }
  0x1c   :  { %s920_s25 = scalar_lea.hbm %s1438_s3, 512 }
  0x1d   :  { %p921_p8 = scmp.ne.s32.totalorder %s1438_s3, %s920_s25  ;;  %p924_p9 = scmp.lt.u32.totalorder %s920_s25, %s1438_s3 }
  0x1f   :  { %p926_p10 = pnand %p924_p9, %p921_p8 }
  0x21   :  { %929 = shalt.err (!%p926_p10)
}
  0x22   :  { %s930_s1 = scalar_lea.vmem %s70_s19, 512  ;;  %p935_p12 = scmp.lt.s32.totalorder %s70_s19, %s70_s19 }
  0x23   :  { %p931_p11 = scmp.ne.s32.totalorder %s70_s19, %s930_s1  ;;  %p936_p13 = scmp.lt.s32.totalorder %s930_s1, %s930_s1 }
  0x25   :  { %p937_p0 = por %p936_p13, %p935_p12 }
  0x27   :  { %p938_p1 = pnand %p937_p0, %p931_p11 }
  0x29   :  { %941 = shalt.err (!%p938_p1)
}
  0x2a   :  { %75 = dma.hbm_to_vmem [thread:$0]  %s1438_s3, 512, %s70_s19, [#allocation10], %s1133_s29, %s1133_s29, %s1134_s30  }
  0x2b   :  { %s942_s20 = scalar_lea.hbm %s1435_s0, 128 }
  0x2c   :  { %p943_p2 = scmp.ne.s32.totalorder %s1435_s0, %s942_s20  ;;  %p946_p3 = scmp.lt.u32.totalorder %s942_s20, %s1435_s0 }
  0x2e   :  { %p948_p4 = pnand %p946_p3, %p943_p2 }
  0x30   :  { %951 = shalt.err (!%p948_p4)
}
  0x31   :  { %s952_s10 = scalar_lea.vmem %s37_s22, 128  ;;  %p957_p6 = scmp.lt.s32.totalorder %s37_s22, %s37_s22 }
  0x32   :  { %p953_p5 = scmp.ne.s32.totalorder %s37_s22, %s952_s10  ;;  %p958_p7 = scmp.lt.s32.totalorder %s952_s10, %s952_s10 }
  0x34   :  { %p959_p8 = por %p958_p7, %p957_p6 }
  0x36   :  { %p960_p9 = pnand %p959_p8, %p953_p5 }
  0x38   :  { %963 = shalt.err (!%p960_p9)
}
  0x39   :  { %39 = dma.hbm_to_vmem [thread:$0]  %s1435_s0, 128, %s37_s22, [#allocation4]  }
  0x3a   :  { %s1137_s27 = smov [#allocation8]   ;;  %s1138_s1 = smov [#allocation11]  }
  0x3b   :  { %s57_s28 = sshll.u32 %s1137_s27, 4  ;;  %s81_s21 = sshll.u32 %s1138_s1, 4  ;;  %s58_s28 = int_to_ptr.vmem [resolvable:$true] %s57_s28  ;;  %s82_s21 = int_to_ptr.vmem [resolvable:$true] %s81_s21 }
  0x3c   :  { %s964_s18 = scalar_lea.hbm %s1437_s2, 256 }
  0x3d   :  { %p965_p10 = scmp.ne.s32.totalorder %s1437_s2, %s964_s18  ;;  %p968_p11 = scmp.lt.u32.totalorder %s964_s18, %s1437_s2 }
  0x3f   :  { %p970_p12 = pnand %p968_p11, %p965_p10 }
  0x41   :  { %973 = shalt.err (!%p970_p12)
}
  0x42   :  { %s974_s0 = scalar_lea.vmem %s58_s28, 256  ;;  %p979_p0 = scmp.lt.s32.totalorder %s58_s28, %s58_s28 }
  0x43   :  { %p975_p13 = scmp.ne.s32.totalorder %s58_s28, %s974_s0  ;;  %p980_p1 = scmp.lt.s32.totalorder %s974_s0, %s974_s0 }
  0x45   :  { %p981_p2 = por %p980_p1, %p979_p0 }
  0x47   :  { %p982_p3 = pnand %p981_p2, %p975_p13 }
  0x49   :  { %985 = shalt.err (!%p982_p3)
}
  0x4a   :  { %63 = dma.hbm_to_vmem [thread:$0]  %s1437_s2, 256, %s58_s28, [#allocation7], %s1133_s29, %s1133_s29, %s1134_s30  }
  0x4b   :  { %s986_s19 = scalar_lea.hbm %s1439_s4, 1024 }
  0x4c   :  { %p987_p4 = scmp.ne.s32.totalorder %s1439_s4, %s986_s19  ;;  %p990_p5 = scmp.lt.u32.totalorder %s986_s19, %s1439_s4 }
  0x4e   :  { %p992_p6 = pnand %p990_p5, %p987_p4 }
  0x50   :  { %995 = shalt.err (!%p992_p6)
}
  0x51   :  { %s996_s18 = scalar_lea.vmem %s82_s21, 1024  ;;  %p1001_p8 = scmp.lt.s32.totalorder %s82_s21, %s82_s21 }
  0x52   :  { %p997_p7 = scmp.ne.s32.totalorder %s82_s21, %s996_s18  ;;  %p1002_p9 = scmp.lt.s32.totalorder %s996_s18, %s996_s18 }
  0x54   :  { %p1003_p10 = por %p1002_p9, %p1001_p8 }
  0x56   :  { %p1004_p11 = pnand %p1003_p10, %p997_p7 }
  0x58   :  { %1007 = shalt.err (!%p1004_p11)
}
  0x59   :  { %87 = dma.hbm_to_vmem [thread:$0]  %s1439_s4, 1024, %s82_s21, [#allocation10], %s1133_s29, %s1133_s29, %s1134_s30  }
  0x5a   :  { %s1139_s20 = smov [#allocation12]   ;;  %s1008_s0 = scalar_lea.hbm %s1442_s7, 512 }
  0x5b   :  { %s97_s23 = sshll.u32 %s1139_s20, 4  ;;  %p1009_p12 = scmp.ne.s32.totalorder %s1442_s7, %s1008_s0  ;;  %s98_s23 = int_to_ptr.vmem [resolvable:$true] %s97_s23 }
  0x5c   :  { %p1012_p13 = scmp.lt.u32.totalorder %s1008_s0, %s1442_s7 }
  0x5e   :  { %p1014_p0 = pnand %p1012_p13, %p1009_p12 }
  0x60   :  { %1017 = shalt.err (!%p1014_p0)
}
  0x61   :  { %s1018_s19 = scalar_lea.vmem %s98_s23, 512  ;;  %p1023_p2 = scmp.lt.s32.totalorder %s98_s23, %s98_s23 }
  0x62   :  { %p1019_p1 = scmp.ne.s32.totalorder %s98_s23, %s1018_s19  ;;  %p1024_p3 = scmp.lt.s32.totalorder %s1018_s19, %s1018_s19 }
  0x64   :  { %p1025_p4 = por %p1024_p3, %p1023_p2 }
  0x66   :  { %p1026_p5 = pnand %p1025_p4, %p1019_p1 }
  0x68   :  { %1029 = shalt.err (!%p1026_p5)
}
  0x69   :  { %103 = dma.hbm_to_vmem [thread:$0]  %s1442_s7, 512, %s98_s23, [#allocation13], %s1133_s29, %s1133_s29, %s1134_s30  }
  0x6a   :  { %1118 = dma.done.wait [#allocation4], 128  }
  0x6b   :  { %1119 = vsyncadd [#allocation4], 4294967168 }
  0x6c   :  { %1120 = dma.done.wait [#allocation7], 512  }
  0x6d   :  { %1121 = vsyncadd [#allocation7], 4294966784 }
  0x6e   :  { %1122 = dma.done.wait [#allocation10], 1536  }
  0x6f   :  { %1123 = vsyncadd [#allocation10], 4294965760 }
  0x70   :  { %1124 = dma.done.wait [#allocation13], 512  }
  0x71   :  { %1125 = vsyncadd [#allocation13], 4294966784  ;;  %v1140_v1 = vmov 0.0|0.0   ;;  %vm1141_vm0 = vmmov 0   ;;  %v1142_v2 = vmov 0.0   ;;  %vm179_vm1 = vcmask 1043456  }
  0x72   :  { %834 = vmatprep.subr.bf16.mxu1 %v1140_v1  ;;  %830 = vmatprep.subr.bf16.mxu0 %v1140_v1  ;;  %vm1143_vm2 = vmmov 1   ;;  %v150_v3 = vld [vmem:[#allocation11] sm:$0xff]  ;;  %v151_v4 = vld [vmem:[#allocation11 + $0x8] sm:$0xff]  ;;  %v144_v5 = vld [vmem:[#allocation8] sm:$0xff]  ;;  %s1144_s1 = smov 64   ;;  %vm175_vm4 = vcmask 97280  }
  0x73   :  { %783 = vmatprep.mubr.msk.f32.mxu0 %vm1141_vm0, %v1142_v2  ;;  %794 = vmatprep.mubr.msk.f32.mxu1 %vm1141_vm0, %v1142_v2  ;;  %vm832_vm3 = vmpackc.low %vm179_vm1, %vm1143_vm2  ;;  %v835_v6 = vpack.c.bf16 %v151_v4, %v150_v3  ;;  %v145_v7 = vld [vmem:[#allocation8 + $0x8] sm:$0xf]  ;;  %v152_v8 = vld [vmem:[#allocation11 + $0x10] sm:$0xff]  ;;  %vm253_vm5 = vcmask 261120   ;;  %s1145_s16 = smov 32   ;;  %s1146_s2 = smov 96  }
  0x74   :  { %v153_v9 = vld [vmem:[#allocation11 + $0x18] sm:$0xff]  ;;  %v831_v10 = vpack.c.bf16 %v145_v7, %v144_v5  ;;  %v746_v11 = vld [vmem:[%s1441_s6] ss:$0 sm:$0xff]  ;;  %v165_v14 = vld [vmem:[#allocation6] sm:$0xff]  ;;  %s1147_s25 = smov 2   ;;  %vm133_vm6 = vcmask 8192  }
  0x75   :  { %836 = vmatpush3.bf16.msra.mxu1 %v835_v6  ;;  %v838_v12 = vpack.c.bf16 %v153_v9, %v152_v8  ;;  %339 = vrot.lane.b32.xlu0 %v746_v11, %s1144_s1  ;;  %v168_v13 = vld [vmem:[#allocation3] sm:$0xff]  ;;  %v741_v21 = vld [vmem:[%s1440_s5] ss:$0 sm:$0xff]  ;;  %v155_v32 = vld [vmem:[#allocation11 + $0x20] sm:$0xff] }
  0x76   :  { %833 = vmatpush3.bf16.msk.msra.mxu0 %vm832_vm3, %v831_v10  ;;  %837 = vmatprep.subr.bf16.mxu1 %v1140_v1  ;;  %v156_v33 = vld [vmem:[#allocation11 + $0x28] sm:$0xff]  ;;  %v157_v34 = vld [vmem:[#allocation11 + $0x30] sm:$0xff]  ;;  %v158_v36 = vld [vmem:[#allocation11 + $0x38] sm:$0xff] }
  0x77   :  { %840 = vmatprep.subr.bf16.mxu0 %v1140_v1  ;;  %v847_v35 = vpack.c.bf16 %v156_v33, %v155_v32  ;;  %v146_v37 = vld [vmem:[#allocation9] sm:$0xff]  ;;  %v147_v38 = vld [vmem:[#allocation9 + $0x8] sm:$0xff]  ;;  %v148_v39 = vld [vmem:[#allocation9 + $0x10] sm:$0xff]  ;;  %v850_v41 = vpack.c.bf16 %v158_v36, %v157_v34 }
  0x78   :  { %v149_v40 = vld [vmem:[#allocation9 + $0x18] sm:$0xff]  ;;  %v841_v42 = vpack.c.bf16 %v147_v38, %v146_v37  ;;  %v167_v44 = vld [vmem:[#allocation6 + $0x8] sm:$0xff]  ;;  %v137_v8 = vld [vmem:[#allocation12] sm:$0xff] }
  0x79   :  { %839 = vmatpush3.bf16.msra.mxu1 %v838_v12  ;;  %784 = vmatmul.mubr.msk.f32.vlgmr.msra.gmra.mrb[0].mxu0 %vm175_vm4, %v168_v13  ;;  %v844_v43 = vpack.c.bf16 %v149_v40, %v148_v39  ;;  %v751_v46 = vld [vmem:[%s1441_s6 + $0x1] ss:$0 sm:$0xff]  ;;  %v138_v9 = vld [vmem:[#allocation12 + $0x8] sm:$0xff]  ;;  %v139_v10 = vld [vmem:[#allocation12 + $0x10] sm:$0xff] }
  0x7a   :  { %846 = vmatprep.subr.bf16.mxu1 %v1140_v1  ;;  %805 = vmatprep.mubr.msk.f32.mxu0 %vm1141_vm0, %v1142_v2  ;;  %v747_v58 = vld [vmem:[%s1440_s5 + $0x1] ss:$0 sm:$0xff]  ;;  %v853_v11 = vpack.c.bf16 %v138_v9, %v137_v8  ;;  %v755_v33 = vld [vmem:[#allocation2] ss:$0 sm:$0xff] }
  0x7b   :  { %842 = vmatpush3.bf16.msra.mxu0 %v841_v42  ;;  %v140_v12 = vld [vmem:[#allocation12 + $0x18] sm:$0xff] }
  0x7c   :  { %795 = vmatmul.mubr.msk.f32.vlgmr.msra.gmra.mrb[0].mxu1 %vm253_vm5, %v165_v14  ;;  %843 = vmatprep.subr.bf16.mxu0 %v1140_v1  ;;  %v856_v13 = vpack.c.bf16 %v140_v12, %v139_v10 }
  0x7d   :  { %816 = vmatprep.mubr.msk.f32.mxu1 %vm1141_vm0, %v1142_v2  ;;  %848 = vmatpush3.bf16.msra.mxu1 %v847_v35 }
  0x7e   :  { %849 = vmatprep.subr.bf16.mxu1 %v1140_v1 }
  0x7f   :  { %845 = vmatpush3.bf16.msra.mxu0 %v844_v43 }
  0x80   :  { %852 = vmatprep.subr.bf16.mxu0 %v1140_v1 }
  0x81   :  { %851 = vmatpush3.bf16.msra.mxu1 %v850_v41 }
  0x84   :  { %817 = vmatmul.mubr.msk.f32.vlgmr.msra.gmra.mrb[2].mxu1 %vm253_vm5, %v167_v44 }
  0xe7   :  { %v340_v16 = vpop.permute.xlu0 %339 }
 0x14c   :  { %v249_v15 = vpop.f32.mrb[0].mxu0 }
 0x14d   :  { %v785_v17 = vpop.f32.mrb[1].mxu0  ;;  %v250_v22 = vadd.f32 %v741_v21, %v249_v15  ;;  %v754_v15 = vld [vmem:[%s1444_s9] ss:$0 sm:$0xff]  ;;  %s1148_s9 = smov 126  }
 0x14f   :  { %v323_v18 = vpop.f32.mrb[0].mxu1 }
 0x150   :  { %v342_v19 = vadd.f32 %v340_v16, %v323_v18  ;;  %v796_v20 = vpop.f32.mrb[1].mxu1  ;;  %v327_v23 = vadd.f32 %v323_v18, %v250_v22 }
 0x152   :  { %344 = vrot.lane.b32.xlu0 %v342_v19, %s1144_s1  ;;  %v745_v24 = vmul.f32 -1.442695, %v327_v23 }
 0x154   :  { %882 = vpow2.f32 %v745_v24 }
 0x156   :  { %360 = vrot.lane.b32.xlu0 %v165_v14, %s1145_s16 }
 0x157   :  { %v515_v53 = vpop.f32.mrb[2].mxu1 }
 0x158   :  { %v818_v54 = vpop.f32.mrb[3].mxu1 }
 0x15a   :  { %531 = vrot.lane.b32.xlu0 %v751_v46, %s1144_s1 }
 0x15e   :  { %v883_v25 = vpop.eup %882 }
 0x15f   :  { %v331_v26 = vadd.f32 1.0, %v883_v25 }
 0x161   :  { %884 = vrcp.f32 %v331_v26 }
 0x16b   :  { %v885_v27 = vpop.eup %884 }
 0x16c   :  { %v354_v48 = vsub.f32 1.0, %v885_v27 }
 0x1c4   :  { %v345_v28 = vpop.permute.xlu0 %344 }
 0x1c5   :  { %v347_v29 = vmul.f32 %v885_v27, %v345_v28 }
 0x1c7   :  { %349 = vrot.lane.b32.xlu1 %v347_v29, %s1144_s1 }
 0x1c8   :  { %v361_v47 = vpop.permute.xlu0 %360 }
 0x1c9   :  { %v363_v50 = vmul.f32 %v885_v27, %v361_v47 }
 0x1cc   :  { %v532_v55 = vpop.permute.xlu0 %531 }
 0x1cd   :  { %v534_v56 = vadd.f32 %v532_v55, %v515_v53 }
 0x239   :  { %v350_v30 = vpop.permute.xlu1 %349 }
 0x23a   :  { %v352_v31 = vadd.f32 %v350_v30, %v250_v22  ;;  %v1149_v30 = vmov 0  }
 0x23b   :  { %880 = vset.pattern.permute.xlu1 %v1149_v30  ;;  %881 = vset.pattern.permute.xlu0 %v1149_v30 }
 0x23c   :  { %886 = vtanh.f32 %v352_v31  ;;  %v130_v31 = vld [vmem:[%s1446_s11] sm:$0x1] }
 0x23d   :  { %v131_v32 = vmul.f32 1.442695, %v130_v31 }
 0x246   :  { %v887_v45 = vpop.eup %886 }
 0x247   :  { %356 = vrot.lane.b32.xlu1 %v887_v45, %s1146_s2 }
 0x2b9   :  { %v357_v49 = vpop.permute.xlu1 %356 }
 0x2ba   :  { %v359_v51 = vmul.f32 %v357_v49, %v354_v48 }
 0x2bc   :  { %v364_v52 = vadd.f32 %v363_v50, %v359_v51 }
 0x2be   :  { %372 = vrot.lane.b32.xlu1 %v364_v52, %s1146_s2 }
 0x2c2   :  { %536 = vrot.lane.b32.xlu1 %v534_v56, %s1144_s1 }
 0x330   :  { %v373_v57 = vpop.permute.xlu1 %372 }
 0x331   :  { %675 = vst.msk [vmem:[#allocation18] sm:$0xff] %vm253_vm5, %v373_v57  ;;  %806 = vmatmul.mubr.msk.f32.vlgmr.msra.gmra.mrb[2].mxu0 %vm253_vm5, %v373_v57 }
 0x332   :  { %827 = vmatprep.mubr.msk.f32.mxu0 %vm1141_vm0, %v1142_v2  ;;  %854 = vmatpush3.bf16.msra.mxu0 %v853_v11 }
 0x333   :  { %855 = vmatprep.subr.bf16.mxu0 %v1140_v1  ;;  %v752_v1 = vld [vmem:[%s1443_s8] ss:$0 sm:$0xff]  ;;  %s1150_s8 = smov [#allocation14]  }
 0x334   :  { %v537_v4 = vpop.permute.xlu1 %536  ;;  %s684_s3 = sshll.u32 %s1150_s8, 4  ;;  %s685_s3 = int_to_ptr.vmem [resolvable:$true] %s684_s3 }
 0x335   :  { %s1030_s19 = scalar_lea.vmem %s685_s3, 128  ;;  %p1035_p7 = scmp.lt.s32.totalorder %s685_s3, %s685_s3 }
 0x336   :  { %857 = vmatpush3.bf16.msra.mxu0 %v856_v13  ;;  %p1031_p6 = scmp.ne.s32.totalorder %s685_s3, %s1030_s19  ;;  %p1036_p8 = scmp.lt.s32.totalorder %s1030_s19, %s1030_s19 }
 0x338   :  { %p1037_p9 = por %p1036_p8, %p1035_p7 }
 0x33a   :  { %p1038_p10 = pnand %p1037_p9, %p1031_p6 }
 0x404   :  { %v442_v59 = vpop.f32.mrb[2].mxu0 }
 0x405   :  { %v443_v60 = vadd.f32 %v747_v58, %v442_v59  ;;  %v807_v61 = vpop.f32.mrb[3].mxu0 }
 0x407   :  { %v519_v62 = vadd.f32 %v515_v53, %v443_v60 }
 0x409   :  { %v750_v63 = vmul.f32 -1.442695, %v519_v62 }
 0x40b   :  { %888 = vpow2.f32 %v750_v63 }
 0x415   :  { %v889_v0 = vpop.eup %888 }
 0x416   :  { %v523_v3 = vadd.f32 1.0, %v889_v0 }
 0x418   :  { %890 = vrcp.f32 %v523_v3 }
 0x422   :  { %v891_v5 = vpop.eup %890 }
 0x423   :  { %v539_v6 = vmul.f32 %v891_v5, %v537_v4  ;;  %v546_v17 = vsub.f32 1.0, %v891_v5 }
 0x425   :  { %541 = vrot.lane.b32.xlu0 %v539_v6, %s1144_s1 }
 0x429   :  { %552 = vrot.lane.b32.xlu0 %v167_v44, %s1145_s16 }
 0x42d   :  { %646 = vrot.lane.b32.xlu0 %v754_v15, %s1147_s25 }
 0x497   :  { %v542_v2 = vpop.permute.xlu0 %541 }
 0x498   :  { %v544_v7 = vadd.f32 %v542_v2, %v443_v60 }
 0x49a   :  { %892 = vtanh.f32 %v544_v7 }
 0x49b   :  { %v553_v16 = vpop.permute.xlu0 %552  ;;  %894 = vpow2.f32 %v131_v32 }
 0x49c   :  { %v555_v19 = vmul.f32 %v891_v5, %v553_v16 }
 0x49f   :  { %v647_v24 = vpop.permute.xlu0 %646 }
 0x4a4   :  { %v893_v14 = vpop.eup %892 }
 0x4a5   :  { %548 = vrot.lane.b32.xlu1 %v893_v14, %s1146_s2  ;;  %v895_v36 = vpop.eup %894 }
 0x4a6   :  { %134 = vst.msk [vmem:[#allocation17] sm:$0x1] %vm133_vm6, %v895_v36 }
 0x517   :  { %v549_v18 = vpop.permute.xlu1 %548 }
 0x518   :  { %v551_v20 = vmul.f32 %v549_v18, %v546_v17 }
 0x51a   :  { %v556_v21 = vadd.f32 %v555_v19, %v551_v20 }
 0x51c   :  { %558 = vrot.lane.b32.xlu1 %v556_v21, %s1146_s2 }
 0x58e   :  { %v559_v22 = vpop.permute.xlu1 %558 }
 0x58f   :  { %561 = vst.msk [vmem:[#allocation14] sm:$0xff] %vm253_vm5, %v559_v22  ;;  %677 = vst.msk [vmem:[#allocation18 + $0x8] sm:$0xff] %vm253_vm5, %v559_v22  ;;  %828 = vmatmul.mubr.msk.f32.vlgmr.msra.gmra.mrb[4].mxu0 %vm253_vm5, %v559_v22 }
 0x662   :  { %v636_v23 = vpop.f32.mrb[4].mxu0 }
 0x663   :  { %v637_v25 = vadd.f32 %v752_v1, %v636_v23  ;;  %v829_v26 = vpop.f32.mrb[5].mxu0 }
 0x665   :  { %v649_v27 = vmul.f32 %v647_v24, %v637_v25 }
 0x667   :  { %651 = vrot.lane.b32.xlu1 %v649_v27, %s1148_s9 }
 0x6d9   :  { %v652_v28 = vpop.permute.xlu1 %651 }
 0x6da   :  { %v654_v29 = vsel %vm253_vm5, %v652_v28, 0.0 }
 0x6db   :  { %655 = vadd.xlane.f32.xlu0 %v654_v29 }
 0x768   :  { %v656_v34 = vpop.xlane.xlu0 %655 }
 0x769   :  { %v663_v35 = vadd.f32 %v755_v33, %v656_v34 }
 0x76b   :  { %668 = vperm.xlu1 %880, %v663_v35  }
 0x76c   :  { %1041 = shalt.err (!%p1038_p10)
}
 0x76d   :  { %s1042_s21 = scalar_lea.hbm %s1447_s12, 128 }
 0x76e   :  { %p1043_p11 = scmp.ne.s32.totalorder %s1447_s12, %s1042_s21  ;;  %p1046_p12 = scmp.lt.u32.totalorder %s1042_s21, %s1447_s12 }
 0x770   :  { %p1048_p13 = pnand %p1046_p12, %p1043_p11 }
 0x772   :  { %1051 = shalt.err (!%p1048_p13)
}
 0x773   :  { %687 = dma.vmem_to_hbm [thread:$0]  %s685_s3, 128, %s1447_s12, [#allocation5]  }
 0x774   :  { %s1151_s2 = smov [#allocation18]  }
 0x775   :  { %s713_s28 = sshll.u32 %s1151_s2, 4  ;;  %s714_s28 = int_to_ptr.vmem [resolvable:$true] %s713_s28 }
 0x776   :  { %s1052_s20 = scalar_lea.vmem %s714_s28, 256  ;;  %p1057_p1 = scmp.lt.s32.totalorder %s714_s28, %s714_s28 }
 0x777   :  { %p1053_p0 = scmp.ne.s32.totalorder %s714_s28, %s1052_s20  ;;  %p1058_p2 = scmp.lt.s32.totalorder %s1052_s20, %s1052_s20 }
 0x779   :  { %p1059_p3 = por %p1058_p2, %p1057_p1 }
 0x77b   :  { %p1060_p4 = pnand %p1059_p3, %p1053_p0 }
 0x77d   :  { %1063 = shalt.err (!%p1060_p4)
}
 0x77e   :  { %s1064_s5 = scalar_lea.hbm %s1450_s15, 256 }
 0x77f   :  { %p1065_p5 = scmp.ne.s32.totalorder %s1450_s15, %s1064_s5  ;;  %p1068_p6 = scmp.lt.u32.totalorder %s1064_s5, %s1450_s15 }
 0x781   :  { %p1070_p7 = pnand %p1068_p6, %p1065_p5 }
 0x783   :  { %1073 = shalt.err (!%p1070_p7)
}
 0x784   :  { %719 = dma.vmem_to_hbm [thread:$0]  %s714_s28, 256, %s1450_s15, [#allocation19], %s1133_s29, %s1133_s29, %s1134_s30   ;;  %v135_v37 = vlaneseq  ;;  %896 = vtanh.f32 %v637_v25 }
 0x785   :  { %s1152_s26 = smov [#allocation15]   ;;  %s1153_s8 = smov [#allocation17]  }
 0x786   :  { %v136_v38 = vand.u32 127, %v135_v37  ;;  %s694_s10 = sshll.u32 %s1152_s26, 4  ;;  %s704_s3 = sshll.u32 %s1153_s8, 4  ;;  %s695_s10 = int_to_ptr.vmem [resolvable:$true] %s694_s10  ;;  %s705_s3 = int_to_ptr.vmem [resolvable:$true] %s704_s3 }
 0x787   :  { %s1074_s19 = scalar_lea.vmem %s695_s10, 128  ;;  %p1079_p9 = scmp.lt.s32.totalorder %s695_s10, %s695_s10 }
 0x788   :  { %vm665_vm7 = vcmp.eq.s32.totalorder %v136_v38, 2  ;;  %vm664_vm8 = vcmp.lt.s32.totalorder %v136_v38, 2  ;;  %p1075_p8 = scmp.ne.s32.totalorder %s695_s10, %s1074_s19  ;;  %p1080_p10 = scmp.lt.s32.totalorder %s1074_s19, %s1074_s19 }
 0x78a   :  { %p1081_p11 = por %p1080_p10, %p1079_p9 }
 0x78c   :  { %p1082_p12 = pnand %p1081_p11, %p1075_p8 }
 0x78e   :  { %v897_v40 = vpop.eup %896 }
 0x7ea   :  { %v669_v39 = vpop.permute.xlu1 %668 }
 0x7eb   :  { %v671_v41 = vsel %vm665_vm7, %v669_v39, 0.0 }
 0x7ec   :  { %v672_v42 = vsel %vm664_vm8, %v897_v40, %v671_v41 }
 0x7ed   :  { %673 = vst [vmem:[#allocation15] sm:$0xff] %v672_v42 }
 0x7ee   :  { %1085 = shalt.err (!%p1082_p12)
}
 0x7ef   :  { %s1086_s30 = scalar_lea.hbm %s1448_s13, 128 }
 0x7f0   :  { %p1087_p13 = scmp.ne.s32.totalorder %s1448_s13, %s1086_s30  ;;  %p1090_p0 = scmp.lt.u32.totalorder %s1086_s30, %s1448_s13 }
 0x7f2   :  { %p1092_p1 = pnand %p1090_p0, %p1087_p13 }
 0x7f4   :  { %1095 = shalt.err (!%p1092_p1)
}
 0x7f5   :  { %697 = dma.vmem_to_hbm [thread:$0]  %s695_s10, 128, %s1448_s13, [#allocation16]  }
 0x7f6   :  { %s1096_s16 = scalar_lea.vmem %s705_s3, 16  ;;  %s1100_s17 = scalar_lea.vmem %s705_s3, 32 }
 0x7f7   :  { %p1097_p2 = scmp.ne.s32.totalorder %s705_s3, %s1096_s16  ;;  %p1101_p3 = scmp.lt.s32.totalorder %s705_s3, %s705_s3 }
 0x7f8   :  { %p1102_p4 = scmp.lt.s32.totalorder %s1100_s17, %s1096_s16 }
 0x7fa   :  { %p1103_p5 = por %p1102_p4, %p1101_p3 }
 0x7fc   :  { %p1104_p6 = pnand %p1103_p5, %p1097_p2 }
 0x7fe   :  { %1107 = shalt.err (!%p1104_p6)
}
 0x7ff   :  { %s1108_s28 = scalar_lea.hbm %s1449_s14, 16 }
 0x800   :  { %p1109_p7 = scmp.ne.s32.totalorder %s1449_s14, %s1108_s28  ;;  %p1112_p8 = scmp.lt.u32.totalorder %s1108_s28, %s1449_s14 }
 0x802   :  { %p1114_p9 = pnand %p1112_p8, %p1109_p7 }
 0x804   :  { %1117 = shalt.err (!%p1114_p9)
}
 0x805   :  { %707 = dma.vmem_to_hbm [thread:$0]  %s705_s3, 16, %s1449_s14, [#allocation16]  }
 0x806   :  { %1126 = dma.done.wait [#allocation5], 128  }
 0x807   :  { %1127 = vsyncadd [#allocation5], 4294967168 }
 0x808   :  { %1128 = dma.done.wait [#allocation16], 144  }
 0x809   :  { %1129 = vsyncadd [#allocation16], 4294967152 }
 0x80a   :  { %1130 = dma.done.wait [#allocation19], 256  }
 0x80b   :  { %1131 = vsyncadd [#allocation19], 4294967040 }
 0x80c   :  { %732 = vsyncpa [#allocation4], 1 }
 0x80d   :  { %733 = vsyncpa [#allocation7], 1 }
 0x80e   :  { %734 = vsyncpa [#allocation10], 1 }
 0x80f   :  { %735 = vsyncpa [#allocation13], 1 }
 0x810   :  { %736 = vsyncpa [#allocation5], 1 }
 0x811   :  { %737 = vsyncpa [#allocation16], 1 }
 0x812   :  { %738 = vsyncpa [#allocation19], 1 }

</bundles_post_ra>
